<compile_context>
chip_gen: v7x
topology: tpu7x:2x2x1
jax: 0.10.0
libtpu: 0.0.40
codegen_flags: <defaults>
</compile_context>

<pallas_src>
import jax
import jax.numpy as jnp
from jax import lax
from jax.experimental import pallas as pl
from jax.experimental.pallas import tpu as pltpu

# ---- model hyperparameters (small, consistent with PIN.__init__) ----
NUM_FEAT = 50          # vocabulary size (num_feat)
NUM_FIELDS = 6         # F
EMB = 8                # embedding_size E
SUBNET = 16            # subnet_size S
HIDDEN = 32            # hidden_size H
BATCH = 8
PAD_IDX = 0            # padding_idx (row re-randomized by xavier init in the ref code)

# pair indices, identical construction order to PINLayer
P1 = [i for i in range(NUM_FIELDS - 1) for _ in range(NUM_FIELDS - 1 - i)]
P2 = [j for i in range(NUM_FIELDS - 1) for j in range(i + 1, NUM_FIELDS)]
NUM_PAIRS = len(P1)    # F*(F-1)//2 = 15

FE = NUM_FIELDS * EMB          # 48
PE = NUM_PAIRS * EMB           # 120
PS = NUM_PAIRS * SUBNET        # 240
PE_PAD = 128                   # pair*emb padded to one full vreg lane width
PS_PAD = 256                   # pair*subnet padded to two full vregs


def _ln(x, n_valid, eps, mask=None):
    """LayerNorm over the last dim with a true element count of `n_valid`.

    Padded lanes of `x` must be exactly zero on entry; if `mask` is given the
    normalized output is re-zeroed outside the valid lanes.
    """
    inv_n = 1.0 / float(n_valid)
    mu = jnp.sum(x, axis=-1, keepdims=True) * inv_n
    c = x - mu
    if mask is not None:
        c = jnp.where(mask, c, 0.0)
    var = jnp.sum(c * c, axis=-1, keepdims=True) * inv_n
    y = (x - mu) * lax.rsqrt(var + eps)
    if mask is not None:
        y = jnp.where(mask, y, 0.0)
    return y


def pin_kernel(x_ref, g_ref, w1_ref, w2_ref, wm1_ref, wm2_ref, bias_ref, out_ref):
    f32 = jnp.float32
    bf16 = jnp.bfloat16
    B = x_ref.shape[0]

    # torch.layer_norm(emb, (F, E)) == row-LN of the flattened (B, F*E) tile
    xn = _ln(x_ref[...], FE, 1e-5)                                        # (B, 48)

    # fused pair gather: one (48, 256) one-hot matmul -> [xp1 | xp2] halves
    xp = jnp.dot(xn.astype(bf16), g_ref[...], preferred_element_type=f32)  # (B, 256)
    xp1 = xp[:, :PE_PAD]                                                  # 128-aligned split
    xp2 = xp[:, PE_PAD:]
    z = jnp.concatenate([xp1, xp2, xp1 * xp2], axis=-1)                   # (B, 384), vreg-aligned

    lane = lax.broadcasted_iota(jnp.int32, (B, PS_PAD), 1)
    valid = lane < PS                                                     # 240 real lanes

    # subnet Linear(3E, S) for all pairs: ONE stacked block-diagonal matmul
    h = jnp.dot(z.astype(bf16), w1_ref[...], preferred_element_type=f32) + bias_ref[0:1, :]
    h = jnp.maximum(_ln(h, PS, 1e-8, valid), 0.0)                         # LN((P,S)) + ReLU
    # subnet Linear(S, S): block-diagonal matmul
    h = jnp.dot(h.astype(bf16), w2_ref[...], preferred_element_type=f32) + bias_ref[1:2, :]
    h = jnp.maximum(_ln(h, PS, 1e-8, valid), 0.0)

    # MLP: the wide pair-major layout IS flatten(1), so layer 1 is one matmul
    g = jnp.dot(h.astype(bf16), wm1_ref[...], preferred_element_type=f32) + bias_ref[2:3, :HIDDEN]
    g = jnp.maximum(_ln(g, HIDDEN, 1e-8), 0.0)
    g = jnp.dot(g.astype(bf16), wm2_ref[...], preferred_element_type=f32) + bias_ref[3:4, :HIDDEN]
    g = jnp.maximum(_ln(g, HIDDEN, 1e-8), 0.0)

    # final Linear(H, 1): lane reduction against the wm3 row stored in the bias pack
    wm3_row = bias_ref[5:6, :HIDDEN]                                      # (1, 32)
    o = jnp.sum(g * wm3_row, axis=-1, keepdims=True) + bias_ref[4:5, 0:1]
    out_ref[...] = jax.nn.sigmoid(o)                                      # one (B, 1) store


def pin_forward(X, params):
    """X: (B, F) int32 feature ids -> (B,) float32 probabilities."""
    B = X.shape[0]
    # glue: embedding gather + flatten (F, E) onto the lane axis
    x_flat = params["emb"][X].reshape(B, FE)

    operands = (x_flat, params["g_pack"], params["w1_pack"], params["w2_pack"],
                params["wm1_pack"], params["wm2_pack"], params["bias_pack"])

    bytes_accessed = sum(int(op.size) * op.dtype.itemsize for op in operands) + B * 4
    flops = 2 * B * (FE * 2 * PE_PAD + 3 * PE_PAD * PS_PAD + PS_PAD * PS_PAD
                     + PS_PAD * HIDDEN + HIDDEN * HIDDEN + HIDDEN)
    cost = pl.CostEstimate(flops=flops, transcendentals=6 * B,
                           bytes_accessed=bytes_accessed)

    out = pl.pallas_call(
        pin_kernel,
        out_shape=jax.ShapeDtypeStruct((B, 1), jnp.float32),
        grid=(1,),                                     # batch fully fused; weights DMA'd once
        in_specs=[pl.BlockSpec(op.shape, lambda i: (0, 0)) for op in operands],
        out_specs=pl.BlockSpec((B, 1), lambda i: (0, 0)),
        compiler_params=pltpu.CompilerParams(dimension_semantics=("arbitrary",)),
        cost_estimate=cost,
    )(*operands)
    return out.reshape(-1)


def init_params(key):
    ks = jax.random.split(key, 11)

    def unif(k, shape, scale):
        return jax.random.uniform(k, shape, jnp.float32, -scale, scale)

    E3 = 3 * EMB
    emb = unif(ks[0], (NUM_FEAT + 1, EMB), (6.0 / (NUM_FEAT + 1 + EMB)) ** 0.5)
    # NOTE: in the reference code xavier_uniform_ overwrites the padding row, so row 0 stays random.
    w1 = unif(ks[1], (E3, SUBNET), E3 ** -0.5)
    b1 = unif(ks[2], (1, SUBNET), E3 ** -0.5)
    w2 = unif(ks[3], (SUBNET, SUBNET), SUBNET ** -0.5)
    b2 = unif(ks[4], (1, SUBNET), SUBNET ** -0.5)
    wm1 = unif(ks[5], (PS, HIDDEN), PS ** -0.5)
    bm1 = unif(ks[6], (1, HIDDEN), PS ** -0.5)
    wm2 = unif(ks[7], (HIDDEN, HIDDEN), HIDDEN ** -0.5)
    bm2 = unif(ks[8], (1, HIDDEN), HIDDEN ** -0.5)
    wm3 = unif(ks[9], (HIDDEN, 1), HIDDEN ** -0.5)
    bm3 = unif(ks[10], (1, 1), HIDDEN ** -0.5)

    # ---- one-time exact repacking into the padded, lane-aligned kernel layout ----
    eye_e = jnp.eye(EMB, dtype=jnp.float32)
    eye_p = jnp.eye(NUM_PAIRS, dtype=jnp.float32)
    s1 = jnp.zeros((NUM_FIELDS, NUM_PAIRS), jnp.float32).at[
        jnp.array(P1), jnp.arange(NUM_PAIRS)].set(1.0)
    s2 = jnp.zeros((NUM_FIELDS, NUM_PAIRS), jnp.float32).at[
        jnp.array(P2), jnp.arange(NUM_PAIRS)].set(1.0)

    def pad_to(m, rows, cols):
        return jnp.pad(m, ((0, rows - m.shape[0]), (0, cols - m.shape[1])))

    # fused pair-gather matrix: (48, 256) = [G1 | G2], each half padded 120 -> 128
    g_pack = jnp.concatenate([pad_to(jnp.kron(s1, eye_e), FE, PE_PAD),
                              pad_to(jnp.kron(s2, eye_e), FE, PE_PAD)], axis=1)

    # fused subnet Linear(3E, S): stacked block-diagonal (384, 256); padded rows/cols zero
    w1_pack = jnp.concatenate(
        [pad_to(jnp.kron(eye_p, w1[i * EMB:(i + 1) * EMB]), PE_PAD, PS_PAD)
         for i in range(3)], axis=0)

    # subnet Linear(S, S): block-diagonal (256, 256); padded rows/cols zero
    w2_pack = pad_to(jnp.kron(eye_p, w2), PS_PAD, PS_PAD)

    # MLP layer 1 weight with zero rows for the 16 padded lanes
    wm1_pack = pad_to(wm1, PS_PAD, HIDDEN)

    # large packed weights travel in bf16 (kernel accumulates in f32 on the MXU)
    bf = jnp.bfloat16
    g_pack = g_pack.astype(bf)
    w1_pack = w1_pack.astype(bf)
    w2_pack = w2_pack.astype(bf)
    wm1_pack = wm1_pack.astype(bf)
    wm2_pack = wm2.astype(bf)

    # single (8, 256) f32 pack of every bias + the final Linear(H,1) weight row
    # (padded lanes are exactly zero so in-kernel LN sums stay exact)
    def row(v):
        return pad_to(v.astype(jnp.float32), 1, PS_PAD)

    bias_pack = jnp.concatenate([
        row(jnp.tile(b1, (1, NUM_PAIRS))),       # row 0: subnet bias 1 (240 valid lanes)
        row(jnp.tile(b2, (1, NUM_PAIRS))),       # row 1: subnet bias 2
        row(bm1),                                 # row 2: MLP bias 1 (32 valid)
        row(bm2),                                 # row 3: MLP bias 2
        row(bm3),                                 # row 4: final bias (1 valid)
        row(wm3.reshape(1, HIDDEN)),              # row 5: final weight row (32 valid)
        jnp.zeros((2, PS_PAD), jnp.float32),      # rows 6-7: sublane padding
    ], axis=0)

    return dict(
        emb=emb, w1=w1, b1=b1, w2=w2, b2=b2,
        wm1=wm1, bm1=bm1, wm2=wm2, bm2=bm2, wm3=wm3, bm3=bm3,
        g_pack=g_pack, w1_pack=w1_pack, w2_pack=w2_pack,
        wm1_pack=wm1_pack, wm2_pack=wm2_pack, bias_pack=bias_pack,
    )


def pin_reference(X, params):
    """Pure-JAX reference mirroring the PyTorch forward (dropout = identity)."""
    x = params["emb"][X]
    mu = x.mean(axis=(1, 2), keepdims=True)
    var = ((x - mu) ** 2).mean(axis=(1, 2), keepdims=True)
    xn = (x - mu) / jnp.sqrt(var + 1e-5)

    xp1 = xn[:, jnp.array(P1), :]
    xp2 = xn[:, jnp.array(P2), :]
    z = jnp.concatenate([xp1, xp2, xp1 * xp2], axis=-1)

    def ln23(t):
        m = t.mean(axis=(1, 2), keepdims=True)
        v = ((t - m) ** 2).mean(axis=(1, 2), keepdims=True)
        return (t - m) / jnp.sqrt(v + 1e-8)

    def ln1(t):
        m = t.mean(axis=-1, keepdims=True)
        v = ((t - m) ** 2).mean(axis=-1, keepdims=True)
        return (t - m) / jnp.sqrt(v + 1e-8)

    h = z @ params["w1"] + params["b1"][0]
    h = jax.nn.relu(ln23(h))
    h = h @ params["w2"] + params["b2"][0]
    h = jax.nn.relu(ln23(h))

    hf = h.reshape(X.shape[0], -1)
    g = hf @ params["wm1"] + params["bm1"][0]
    g = jax.nn.relu(ln1(g))
    g = g @ params["wm2"] + params["bm2"][0]
    g = jax.nn.relu(ln1(g))
    o = g @ params["wm3"] + params["bm3"][0]
    return jax.nn.sigmoid(o).reshape(-1)


if __name__ == "__main__":
    key = jax.random.PRNGKey(0)
    pkey, xkey = jax.random.split(key)
    params = init_params(pkey)
    X = jax.random.randint(xkey, (BATCH, NUM_FIELDS), 1, NUM_FEAT + 1, dtype=jnp.int32)

    out = jax.block_until_ready(pin_forward(X, params))

    # exact-math reference under a *local* high-precision scope (no global side effects)
    with jax.default_matmul_precision("highest"):
        ref = jax.block_until_ready(pin_reference(X, params))

    assert out.shape == (BATCH,), out.shape
    assert bool(jnp.all(jnp.isfinite(out)))
    # kernel matmuls use bf16 operands with f32 accumulation, so compare at a
    # correspondingly relaxed tolerance against the f32 reference
    assert jnp.allclose(out, ref, atol=2e-2, rtol=2e-2), (out, ref)
    print("KERNEL_OK")
</pallas_src>

<mosaic_0001>
module attributes {stable_mosaic.version = 11 : i64} {
  func.func @pin_kernel(%arg0: i32, %arg1: memref<8x48xf32, #tpu.memory_space<vmem>>, %arg2: memref<48x256xbf16, #tpu.memory_space<vmem>>, %arg3: memref<384x256xbf16, #tpu.memory_space<vmem>>, %arg4: memref<256x256xbf16, #tpu.memory_space<vmem>>, %arg5: memref<256x32xbf16, #tpu.memory_space<vmem>>, %arg6: memref<32x32xbf16, #tpu.memory_space<vmem>>, %arg7: memref<8x256xf32, #tpu.memory_space<vmem>>, %arg8: memref<8x1xf32, #tpu.memory_space<vmem>>) attributes {dimension_semantics = [#tpu.dimension_semantics<arbitrary>], iteration_bounds = array<i64: 1>, scalar_prefetch = 0 : i64, scratch_operands = 0 : i64, tpu.core_type = #tpu.core_type<tc>, window_params = [{pipeline_mode = #tpu.pipeline_mode<synchronous>, transform_indices = @transform_0, window_bounds = array<i64: 8, 48>}, {pipeline_mode = #tpu.pipeline_mode<synchronous>, transform_indices = @transform_1, window_bounds = array<i64: 48, 256>}, {pipeline_mode = #tpu.pipeline_mode<synchronous>, transform_indices = @transform_2, window_bounds = array<i64: 384, 256>}, {pipeline_mode = #tpu.pipeline_mode<synchronous>, transform_indices = @transform_3, window_bounds = array<i64: 256, 256>}, {pipeline_mode = #tpu.pipeline_mode<synchronous>, transform_indices = @transform_4, window_bounds = array<i64: 256, 32>}, {pipeline_mode = #tpu.pipeline_mode<synchronous>, transform_indices = @transform_5, window_bounds = array<i64: 32, 32>}, {pipeline_mode = #tpu.pipeline_mode<synchronous>, transform_indices = @transform_6, window_bounds = array<i64: 8, 256>}, {pipeline_mode = #tpu.pipeline_mode<synchronous>, transform_indices = @transform_7, window_bounds = array<i64: 8, 1>}]} {
    %c0 = arith.constant 0 : index
    %c0_0 = arith.constant 0 : index
    %0 = vector.load %arg1[%c0, %c0_0] : memref<8x48xf32, #tpu.memory_space<vmem>>, vector<8x48xf32>
    %cst = arith.constant dense<0.000000e+00> : vector<8xf32>
    %1 = vector.multi_reduction <add>, %0, %cst [1] : vector<8x48xf32> to vector<8xf32>
    %2 = vector.shape_cast %1 : vector<8xf32> to vector<8x1xf32>
    %cst_1 = arith.constant 0.020833334 : f32
    %3 = vector.broadcast %cst_1 : f32 to vector<8x1xf32>
    %4 = arith.mulf %2, %3 : vector<8x1xf32>
    %5 = vector.broadcast %4 : vector<8x1xf32> to vector<8x48xf32>
    %6 = arith.subf %0, %5 : vector<8x48xf32>
    %7 = arith.mulf %6, %6 : vector<8x48xf32>
    %cst_2 = arith.constant dense<0.000000e+00> : vector<8xf32>
    %8 = vector.multi_reduction <add>, %7, %cst_2 [1] : vector<8x48xf32> to vector<8xf32>
    %9 = vector.shape_cast %8 : vector<8xf32> to vector<8x1xf32>
    %cst_3 = arith.constant 0.020833334 : f32
    %10 = vector.broadcast %cst_3 : f32 to vector<8x1xf32>
    %11 = arith.mulf %9, %10 : vector<8x1xf32>
    %12 = vector.broadcast %4 : vector<8x1xf32> to vector<8x48xf32>
    %13 = arith.subf %0, %12 : vector<8x48xf32>
    %cst_4 = arith.constant 9.99999974E-6 : f32
    %14 = vector.broadcast %cst_4 : f32 to vector<8x1xf32>
    %15 = arith.addf %11, %14 : vector<8x1xf32>
    %16 = math.rsqrt %15 : vector<8x1xf32>
    %17 = vector.broadcast %16 : vector<8x1xf32> to vector<8x48xf32>
    %18 = arith.mulf %13, %17 : vector<8x48xf32>
    %19 = arith.truncf %18 : vector<8x48xf32> to vector<8x48xbf16>
    %c0_5 = arith.constant 0 : index
    %c0_6 = arith.constant 0 : index
    %20 = vector.load %arg2[%c0_5, %c0_6] : memref<48x256xbf16, #tpu.memory_space<vmem>>, vector<48x256xbf16>
    %cst_7 = arith.constant dense<0.000000e+00> : vector<8x256xf32>
    %21 = tpu.matmul %19, %20, %cst_7 {dimension_numbers = #tpu.dot_dimension_numbers<[1], [0], [0], [1], [0, 0, 1, 1], [], []>} : vector<8x48xbf16>, vector<48x256xbf16>, vector<8x256xf32> -> vector<8x256xf32>
    %22 = vector.extract_strided_slice %21 {offsets = [0, 0], sizes = [8, 128], strides = [1, 1]} : vector<8x256xf32> to vector<8x128xf32>
    %23 = vector.extract_strided_slice %21 {offsets = [0, 128], sizes = [8, 128], strides = [1, 1]} : vector<8x256xf32> to vector<8x128xf32>
    %24 = arith.mulf %22, %23 : vector<8x128xf32>
    %25 = tpu.concatenate %22, %23, %24 in 1 : vector<8x128xf32>, vector<8x128xf32>, vector<8x128xf32> -> vector<8x384xf32>
    %26 = tpu.iota {dimensions = array<i32: 1>} : vector<8x256xi32>
    %c240_i32 = arith.constant 240 : i32
    %27 = vector.broadcast %c240_i32 : i32 to vector<8x256xi32>
    %28 = arith.cmpi slt, %26, %27 : vector<8x256xi32>
    %29 = arith.truncf %25 : vector<8x384xf32> to vector<8x384xbf16>
    %c0_8 = arith.constant 0 : index
    %c0_9 = arith.constant 0 : index
    %30 = vector.load %arg3[%c0_8, %c0_9] : memref<384x256xbf16, #tpu.memory_space<vmem>>, vector<384x256xbf16>
    %cst_10 = arith.constant dense<0.000000e+00> : vector<8x256xf32>
    %31 = tpu.matmul %29, %30, %cst_10 {dimension_numbers = #tpu.dot_dimension_numbers<[1], [0], [0], [1], [0, 0, 1, 1], [], []>} : vector<8x384xbf16>, vector<384x256xbf16>, vector<8x256xf32> -> vector<8x256xf32>
    %c0_11 = arith.constant 0 : index
    %c0_12 = arith.constant 0 : index
    %32 = vector.load %arg7[%c0_11, %c0_12] : memref<8x256xf32, #tpu.memory_space<vmem>>, vector<1x256xf32>
    %33 = vector.broadcast %32 : vector<1x256xf32> to vector<8x256xf32>
    %34 = arith.addf %31, %33 : vector<8x256xf32>
    %cst_13 = arith.constant dense<0.000000e+00> : vector<8xf32>
    %35 = vector.multi_reduction <add>, %34, %cst_13 [1] : vector<8x256xf32> to vector<8xf32>
    %36 = vector.shape_cast %35 : vector<8xf32> to vector<8x1xf32>
    %cst_14 = arith.constant 0.00416666688 : f32
    %37 = vector.broadcast %cst_14 : f32 to vector<8x1xf32>
    %38 = arith.mulf %36, %37 : vector<8x1xf32>
    %39 = vector.broadcast %38 : vector<8x1xf32> to vector<8x256xf32>
    %40 = arith.subf %34, %39 : vector<8x256xf32>
    %cst_15 = arith.constant 0.000000e+00 : f32
    %41 = vector.broadcast %cst_15 : f32 to vector<8x256xf32>
    %42 = arith.select %28, %40, %41 : vector<8x256xi1>, vector<8x256xf32>
    %43 = arith.mulf %42, %42 : vector<8x256xf32>
    %cst_16 = arith.constant dense<0.000000e+00> : vector<8xf32>
    %44 = vector.multi_reduction <add>, %43, %cst_16 [1] : vector<8x256xf32> to vector<8xf32>
    %45 = vector.shape_cast %44 : vector<8xf32> to vector<8x1xf32>
    %cst_17 = arith.constant 0.00416666688 : f32
    %46 = vector.broadcast %cst_17 : f32 to vector<8x1xf32>
    %47 = arith.mulf %45, %46 : vector<8x1xf32>
    %48 = vector.broadcast %38 : vector<8x1xf32> to vector<8x256xf32>
    %49 = arith.subf %34, %48 : vector<8x256xf32>
    %cst_18 = arith.constant 9.99999993E-9 : f32
    %50 = vector.broadcast %cst_18 : f32 to vector<8x1xf32>
    %51 = arith.addf %47, %50 : vector<8x1xf32>
    %52 = math.rsqrt %51 : vector<8x1xf32>
    %53 = vector.broadcast %52 : vector<8x1xf32> to vector<8x256xf32>
    %54 = arith.mulf %49, %53 : vector<8x256xf32>
    %cst_19 = arith.constant 0.000000e+00 : f32
    %55 = vector.broadcast %cst_19 : f32 to vector<8x256xf32>
    %56 = arith.select %28, %54, %55 : vector<8x256xi1>, vector<8x256xf32>
    %cst_20 = arith.constant 0.000000e+00 : f32
    %57 = vector.broadcast %cst_20 : f32 to vector<8x256xf32>
    %58 = arith.maximumf %56, %57 : vector<8x256xf32>
    %59 = arith.truncf %58 : vector<8x256xf32> to vector<8x256xbf16>
    %c0_21 = arith.constant 0 : index
    %c0_22 = arith.constant 0 : index
    %60 = vector.load %arg4[%c0_21, %c0_22] : memref<256x256xbf16, #tpu.memory_space<vmem>>, vector<256x256xbf16>
    %cst_23 = arith.constant dense<0.000000e+00> : vector<8x256xf32>
    %61 = tpu.matmul %59, %60, %cst_23 {dimension_numbers = #tpu.dot_dimension_numbers<[1], [0], [0], [1], [0, 0, 1, 1], [], []>} : vector<8x256xbf16>, vector<256x256xbf16>, vector<8x256xf32> -> vector<8x256xf32>
    %c1 = arith.constant 1 : index
    %c0_24 = arith.constant 0 : index
    %62 = vector.load %arg7[%c1, %c0_24] : memref<8x256xf32, #tpu.memory_space<vmem>>, vector<1x256xf32>
    %63 = vector.broadcast %62 : vector<1x256xf32> to vector<8x256xf32>
    %64 = arith.addf %61, %63 : vector<8x256xf32>
    %cst_25 = arith.constant dense<0.000000e+00> : vector<8xf32>
    %65 = vector.multi_reduction <add>, %64, %cst_25 [1] : vector<8x256xf32> to vector<8xf32>
    %66 = vector.shape_cast %65 : vector<8xf32> to vector<8x1xf32>
    %cst_26 = arith.constant 0.00416666688 : f32
    %67 = vector.broadcast %cst_26 : f32 to vector<8x1xf32>
    %68 = arith.mulf %66, %67 : vector<8x1xf32>
    %69 = vector.broadcast %68 : vector<8x1xf32> to vector<8x256xf32>
    %70 = arith.subf %64, %69 : vector<8x256xf32>
    %cst_27 = arith.constant 0.000000e+00 : f32
    %71 = vector.broadcast %cst_27 : f32 to vector<8x256xf32>
    %72 = arith.select %28, %70, %71 : vector<8x256xi1>, vector<8x256xf32>
    %73 = arith.mulf %72, %72 : vector<8x256xf32>
    %cst_28 = arith.constant dense<0.000000e+00> : vector<8xf32>
    %74 = vector.multi_reduction <add>, %73, %cst_28 [1] : vector<8x256xf32> to vector<8xf32>
    %75 = vector.shape_cast %74 : vector<8xf32> to vector<8x1xf32>
    %cst_29 = arith.constant 0.00416666688 : f32
    %76 = vector.broadcast %cst_29 : f32 to vector<8x1xf32>
    %77 = arith.mulf %75, %76 : vector<8x1xf32>
    %78 = vector.broadcast %68 : vector<8x1xf32> to vector<8x256xf32>
    %79 = arith.subf %64, %78 : vector<8x256xf32>
    %cst_30 = arith.constant 9.99999993E-9 : f32
    %80 = vector.broadcast %cst_30 : f32 to vector<8x1xf32>
    %81 = arith.addf %77, %80 : vector<8x1xf32>
    %82 = math.rsqrt %81 : vector<8x1xf32>
    %83 = vector.broadcast %82 : vector<8x1xf32> to vector<8x256xf32>
    %84 = arith.mulf %79, %83 : vector<8x256xf32>
    %cst_31 = arith.constant 0.000000e+00 : f32
    %85 = vector.broadcast %cst_31 : f32 to vector<8x256xf32>
    %86 = arith.select %28, %84, %85 : vector<8x256xi1>, vector<8x256xf32>
    %cst_32 = arith.constant 0.000000e+00 : f32
    %87 = vector.broadcast %cst_32 : f32 to vector<8x256xf32>
    %88 = arith.maximumf %86, %87 : vector<8x256xf32>
    %89 = arith.truncf %88 : vector<8x256xf32> to vector<8x256xbf16>
    %c0_33 = arith.constant 0 : index
    %c0_34 = arith.constant 0 : index
    %90 = vector.load %arg5[%c0_33, %c0_34] : memref<256x32xbf16, #tpu.memory_space<vmem>>, vector<256x32xbf16>
    %cst_35 = arith.constant dense<0.000000e+00> : vector<8x32xf32>
    %91 = tpu.matmul %89, %90, %cst_35 {dimension_numbers = #tpu.dot_dimension_numbers<[1], [0], [0], [1], [0, 0, 1, 1], [], []>} : vector<8x256xbf16>, vector<256x32xbf16>, vector<8x32xf32> -> vector<8x32xf32>
    %c2 = arith.constant 2 : index
    %c0_36 = arith.constant 0 : index
    %92 = vector.load %arg7[%c2, %c0_36] : memref<8x256xf32, #tpu.memory_space<vmem>>, vector<1x32xf32>
    %93 = vector.broadcast %92 : vector<1x32xf32> to vector<8x32xf32>
    %94 = arith.addf %91, %93 : vector<8x32xf32>
    %cst_37 = arith.constant dense<0.000000e+00> : vector<8xf32>
    %95 = vector.multi_reduction <add>, %94, %cst_37 [1] : vector<8x32xf32> to vector<8xf32>
    %96 = vector.shape_cast %95 : vector<8xf32> to vector<8x1xf32>
    %cst_38 = arith.constant 3.125000e-02 : f32
    %97 = vector.broadcast %cst_38 : f32 to vector<8x1xf32>
    %98 = arith.mulf %96, %97 : vector<8x1xf32>
    %99 = vector.broadcast %98 : vector<8x1xf32> to vector<8x32xf32>
    %100 = arith.subf %94, %99 : vector<8x32xf32>
    %101 = arith.mulf %100, %100 : vector<8x32xf32>
    %cst_39 = arith.constant dense<0.000000e+00> : vector<8xf32>
    %102 = vector.multi_reduction <add>, %101, %cst_39 [1] : vector<8x32xf32> to vector<8xf32>
    %103 = vector.shape_cast %102 : vector<8xf32> to vector<8x1xf32>
    %cst_40 = arith.constant 3.125000e-02 : f32
    %104 = vector.broadcast %cst_40 : f32 to vector<8x1xf32>
    %105 = arith.mulf %103, %104 : vector<8x1xf32>
    %106 = vector.broadcast %98 : vector<8x1xf32> to vector<8x32xf32>
    %107 = arith.subf %94, %106 : vector<8x32xf32>
    %cst_41 = arith.constant 9.99999993E-9 : f32
    %108 = vector.broadcast %cst_41 : f32 to vector<8x1xf32>
    %109 = arith.addf %105, %108 : vector<8x1xf32>
    %110 = math.rsqrt %109 : vector<8x1xf32>
    %111 = vector.broadcast %110 : vector<8x1xf32> to vector<8x32xf32>
    %112 = arith.mulf %107, %111 : vector<8x32xf32>
    %cst_42 = arith.constant 0.000000e+00 : f32
    %113 = vector.broadcast %cst_42 : f32 to vector<8x32xf32>
    %114 = arith.maximumf %112, %113 : vector<8x32xf32>
    %115 = arith.truncf %114 : vector<8x32xf32> to vector<8x32xbf16>
    %c0_43 = arith.constant 0 : index
    %c0_44 = arith.constant 0 : index
    %116 = vector.load %arg6[%c0_43, %c0_44] : memref<32x32xbf16, #tpu.memory_space<vmem>>, vector<32x32xbf16>
    %cst_45 = arith.constant dense<0.000000e+00> : vector<8x32xf32>
    %117 = tpu.matmul %115, %116, %cst_45 {dimension_numbers = #tpu.dot_dimension_numbers<[1], [0], [0], [1], [0, 0, 1, 1], [], []>} : vector<8x32xbf16>, vector<32x32xbf16>, vector<8x32xf32> -> vector<8x32xf32>
    %c3 = arith.constant 3 : index
    %c0_46 = arith.constant 0 : index
    %118 = vector.load %arg7[%c3, %c0_46] : memref<8x256xf32, #tpu.memory_space<vmem>>, vector<1x32xf32>
    %119 = vector.broadcast %118 : vector<1x32xf32> to vector<8x32xf32>
    %120 = arith.addf %117, %119 : vector<8x32xf32>
    %cst_47 = arith.constant dense<0.000000e+00> : vector<8xf32>
    %121 = vector.multi_reduction <add>, %120, %cst_47 [1] : vector<8x32xf32> to vector<8xf32>
    %122 = vector.shape_cast %121 : vector<8xf32> to vector<8x1xf32>
    %cst_48 = arith.constant 3.125000e-02 : f32
    %123 = vector.broadcast %cst_48 : f32 to vector<8x1xf32>
    %124 = arith.mulf %122, %123 : vector<8x1xf32>
    %125 = vector.broadcast %124 : vector<8x1xf32> to vector<8x32xf32>
    %126 = arith.subf %120, %125 : vector<8x32xf32>
    %127 = arith.mulf %126, %126 : vector<8x32xf32>
    %cst_49 = arith.constant dense<0.000000e+00> : vector<8xf32>
    %128 = vector.multi_reduction <add>, %127, %cst_49 [1] : vector<8x32xf32> to vector<8xf32>
    %129 = vector.shape_cast %128 : vector<8xf32> to vector<8x1xf32>
    %cst_50 = arith.constant 3.125000e-02 : f32
    %130 = vector.broadcast %cst_50 : f32 to vector<8x1xf32>
    %131 = arith.mulf %129, %130 : vector<8x1xf32>
    %132 = vector.broadcast %124 : vector<8x1xf32> to vector<8x32xf32>
    %133 = arith.subf %120, %132 : vector<8x32xf32>
    %cst_51 = arith.constant 9.99999993E-9 : f32
    %134 = vector.broadcast %cst_51 : f32 to vector<8x1xf32>
    %135 = arith.addf %131, %134 : vector<8x1xf32>
    %136 = math.rsqrt %135 : vector<8x1xf32>
    %137 = vector.broadcast %136 : vector<8x1xf32> to vector<8x32xf32>
    %138 = arith.mulf %133, %137 : vector<8x32xf32>
    %cst_52 = arith.constant 0.000000e+00 : f32
    %139 = vector.broadcast %cst_52 : f32 to vector<8x32xf32>
    %140 = arith.maximumf %138, %139 : vector<8x32xf32>
    %c5 = arith.constant 5 : index
    %c0_53 = arith.constant 0 : index
    %141 = vector.load %arg7[%c5, %c0_53] : memref<8x256xf32, #tpu.memory_space<vmem>>, vector<1x32xf32>
    %142 = vector.broadcast %141 : vector<1x32xf32> to vector<8x32xf32>
    %143 = arith.mulf %140, %142 : vector<8x32xf32>
    %cst_54 = arith.constant dense<0.000000e+00> : vector<8xf32>
    %144 = vector.multi_reduction <add>, %143, %cst_54 [1] : vector<8x32xf32> to vector<8xf32>
    %145 = vector.shape_cast %144 : vector<8xf32> to vector<8x1xf32>
    %c4 = arith.constant 4 : index
    %c0_55 = arith.constant 0 : index
    %146 = vector.load %arg7[%c4, %c0_55] : memref<8x256xf32, #tpu.memory_space<vmem>>, vector<1x1xf32>
    %147 = vector.broadcast %146 : vector<1x1xf32> to vector<8x1xf32>
    %148 = arith.addf %145, %147 : vector<8x1xf32>
    %149 = arith.negf %148 : vector<8x1xf32>
    %150 = math.exp %149 : vector<8x1xf32>
    %cst_56 = arith.constant 1.000000e+00 : f32
    %151 = vector.broadcast %cst_56 : f32 to vector<8x1xf32>
    %152 = arith.addf %151, %150 : vector<8x1xf32>
    %153 = arith.divf %151, %152 : vector<8x1xf32>
    %c0_57 = arith.constant 0 : index
    %c0_58 = arith.constant 0 : index
    %154 = vector.load %arg8[%c0_57, %c0_58] : memref<8x1xf32, #tpu.memory_space<vmem>>, vector<8x1xf32>
    tpu.vector_store %arg8[%c0_57, %c0_58], %153 {strides = array<i32>} : memref<8x1xf32, #tpu.memory_space<vmem>>, vector<8x1xf32>,
    return
  }
  func.func @transform_0(%arg0: i32) -> (i32, i32) {
    %c0_i32 = arith.constant 0 : i32
    %c0_i32_0 = arith.constant 0 : i32
    %c0_i32_1 = arith.constant 0 : i32
    return %c0_i32, %c0_i32_0 : i32, i32
  }
  func.func @transform_1(%arg0: i32) -> (i32, i32) {
    %c0_i32 = arith.constant 0 : i32
    %c0_i32_0 = arith.constant 0 : i32
    %c0_i32_1 = arith.constant 0 : i32
    return %c0_i32, %c0_i32_0 : i32, i32
  }
  func.func @transform_2(%arg0: i32) -> (i32, i32) {
    %c0_i32 = arith.constant 0 : i32
    %c0_i32_0 = arith.constant 0 : i32
    %c0_i32_1 = arith.constant 0 : i32
    return %c0_i32, %c0_i32_0 : i32, i32
  }
  func.func @transform_3(%arg0: i32) -> (i32, i32) {
    %c0_i32 = arith.constant 0 : i32
    %c0_i32_0 = arith.constant 0 : i32
    %c0_i32_1 = arith.constant 0 : i32
    return %c0_i32, %c0_i32_0 : i32, i32
  }
  func.func @transform_4(%arg0: i32) -> (i32, i32) {
    %c0_i32 = arith.constant 0 : i32
    %c0_i32_0 = arith.constant 0 : i32
    %c0_i32_1 = arith.constant 0 : i32
    return %c0_i32, %c0_i32_0 : i32, i32
  }
  func.func @transform_5(%arg0: i32) -> (i32, i32) {
    %c0_i32 = arith.constant 0 : i32
    %c0_i32_0 = arith.constant 0 : i32
    %c0_i32_1 = arith.constant 0 : i32
    return %c0_i32, %c0_i32_0 : i32, i32
  }
  func.func @transform_6(%arg0: i32) -> (i32, i32) {
    %c0_i32 = arith.constant 0 : i32
    %c0_i32_0 = arith.constant 0 : i32
    %c0_i32_1 = arith.constant 0 : i32
    return %c0_i32, %c0_i32_0 : i32, i32
  }
  func.func @transform_7(%arg0: i32) -> (i32, i32) {
    %c0_i32 = arith.constant 0 : i32
    %c0_i32_0 = arith.constant 0 : i32
    %c0_i32_1 = arith.constant 0 : i32
    return %c0_i32, %c0_i32_0 : i32, i32
  }
}

</mosaic_0001>

<bundles_post_ra>
// kernel: tpu_custom_call.1
= control target key start
LH: loop header
LB: loop body
LE: loop exit
PB: predicated region body
PF: predicated region fallthrough
CT: control target
= control target key end

     0   :  { %12 = vsyncpa [#allocation3], 0  ;;  %s1685_s0 = inlined_call_operand.vmem [shape: f32[8,48], index: 0, kind: input, shape index: {}]   ;;  %s1686_s1 = inlined_call_operand.vmem [shape: bf16[48,256], index: 1, kind: input, shape index: {}]   ;;  %s1687_s2 = inlined_call_operand.hbm [shape: bf16[384,256], index: 2, kind: input, shape index: {}]   ;;  %s1688_s3 = inlined_call_operand.hbm [shape: bf16[256,256], index: 3, kind: input, shape index: {}]   ;;  %s1689_s4 = inlined_call_operand.vmem [shape: bf16[256,32], index: 4, kind: input, shape index: {}]   ;;  %s1690_s5 = inlined_call_operand.vmem [shape: bf16[32,32], index: 5, kind: input, shape index: {}]   ;;  %s1691_s6 = inlined_call_operand.vmem [shape: f32[8,256], index: 6, kind: input, shape index: {}]   ;;  %s1692_s7 = inlined_call_operand.vmem [shape: f32[8,1], index: 7, kind: output, shape index: {}]  }
   0x1   :  { %13 = vsyncpa [#allocation5], 0  ;;  %s1479_s24 = smov [#allocation2]   ;;  %s1431_s28 = scalar_lea.hbm %s1687_s2, 6144 }
   0x2   :  { %s23_s25 = sshll.u32 %s1479_s24, 4  ;;  %p1432_p0 = scmp.ne.s32.totalorder %s1687_s2, %s1431_s28  ;;  %s24_s25 = int_to_ptr.vmem [resolvable:$true] %s23_s25 }
   0x3   :  { %p1435_p1 = scmp.lt.u32.totalorder %s1431_s28, %s1687_s2 }
   0x5   :  { %p1437_p2 = pnand %p1435_p1, %p1432_p0 }
   0x7   :  { %1440 = shalt.err (!%p1437_p2)
}
   0x8   :  { %s1441_s10 = scalar_lea.vmem %s24_s25, 6144  ;;  %p1446_p4 = scmp.lt.s32.totalorder %s24_s25, %s24_s25 }
   0x9   :  { %p1442_p3 = scmp.ne.s32.totalorder %s24_s25, %s1441_s10  ;;  %p1447_p5 = scmp.lt.s32.totalorder %s1441_s10, %s1441_s10 }
   0xb   :  { %p1448_p6 = por %p1447_p5, %p1446_p4 }
   0xd   :  { %p1449_p7 = pnand %p1448_p6, %p1442_p3 }
   0xf   :  { %1452 = shalt.err (!%p1449_p7)
}
  0x10   :  { %s1480_s11 = smov 128   ;;  %s1481_s12 = smov 8  }
  0x11   :  { %29 = dma.hbm_to_vmem [thread:$0]  %s1687_s2, 6144, %s24_s25, [#allocation3], %s1480_s11, %s1480_s11, %s1481_s12  }
  0x12   :  { %s1482_s15 = smov [#allocation4]   ;;  %s1453_s19 = scalar_lea.hbm %s1688_s3, 4096 }
  0x13   :  { %s35_s16 = sshll.u32 %s1482_s15, 4  ;;  %p1454_p8 = scmp.ne.s32.totalorder %s1688_s3, %s1453_s19  ;;  %s36_s16 = int_to_ptr.vmem [resolvable:$true] %s35_s16 }
  0x14   :  { %p1457_p9 = scmp.lt.u32.totalorder %s1453_s19, %s1688_s3 }
  0x16   :  { %p1459_p10 = pnand %p1457_p9, %p1454_p8 }
  0x18   :  { %1462 = shalt.err (!%p1459_p10)
}
  0x19   :  { %s1463_s24 = scalar_lea.vmem %s36_s16, 4096  ;;  %p1468_p12 = scmp.lt.s32.totalorder %s36_s16, %s36_s16 }
  0x1a   :  { %p1464_p11 = scmp.ne.s32.totalorder %s36_s16, %s1463_s24  ;;  %p1469_p13 = scmp.lt.s32.totalorder %s1463_s24, %s1463_s24 }
  0x1c   :  { %p1470_p0 = por %p1469_p13, %p1468_p12 }
  0x1e   :  { %p1471_p1 = pnand %p1470_p0, %p1464_p11 }
  0x20   :  { %1474 = shalt.err (!%p1471_p1)
}
  0x21   :  { %41 = dma.hbm_to_vmem [thread:$0]  %s1688_s3, 4096, %s36_s16, [#allocation5], %s1480_s11, %s1480_s11, %s1481_s12  }
  0x22   :  { %1475 = dma.done.wait [#allocation3], 6144  }
  0x23   :  { %1476 = vsyncadd [#allocation3], 4294961152 }
  0x24   :  { %1477 = dma.done.wait [#allocation5], 4096  }
  0x25   :  { %1478 = vsyncadd [#allocation5], 4294963200  ;;  %vm56_vm0 = vcmask 392192   ;;  %v55_v0 = vld [vmem:[%s1685_s0] sm:$0xff]  ;;  %v1273_v9 = vld [vmem:[%s1686_s1 + $0x14] ss:$8 sps:$4 sm:$0xff]  }
  0x26   :  { %v57_v1 = vsel %vm56_vm0, %v55_v0, 0.0  ;;  %v1270_v7 = vld [vmem:[%s1686_s1 + $0x4] ss:$8 sps:$4 sm:$0xff]   ;;  %v1272_v8 = vld [vmem:[%s1686_s1] ss:$8 sps:$4 sm:$0xff]   ;;  %v1483_v11 = vmov 0  }
  0x27   :  { %58 = vadd.xlane.f32.xlu0 %v57_v1  ;;  %110 = vmatprep.subr.bf16.mxu0 %v1270_v7  ;;  %v1275_v10 = vld [vmem:[%s1686_s1 + $0x10] ss:$8 sps:$4 sm:$0xff]   ;;  %v1276_v12 = vld [vmem:[%s1686_s1 + $0x24] ss:$8 sps:$4 sm:$0xff]   ;;  %v1278_v13 = vld [vmem:[%s1686_s1 + $0x20] ss:$8 sps:$4 sm:$0xff]  }
  0x28   :  { %111 = vmatpush1.bf16.msra.mxu0 %v1272_v8  ;;  %142 = vmatprep.mubr.bf16.mxu0 %v1483_v11  ;;  %v1279_v14 = vld [vmem:[#allocation2 + $0x4] ss:$8 sps:$4 sm:$0xff]   ;;  %v1281_v15 = vld [vmem:[#allocation2] ss:$8 sps:$4 sm:$0xff]   ;;  %v1282_v16 = vld [vmem:[#allocation2 + $0x14] ss:$8 sps:$4 sm:$0xff]  }
  0x29   :  { %112 = vmatprep.subr.bf16.mxu0 %v1273_v9  ;;  %460 = vmatprep.subr.bf16.mxu1 %v1279_v14  ;;  %v1284_v17 = vld [vmem:[#allocation2 + $0x10] ss:$8 sps:$4 sm:$0xff]   ;;  %v1285_v18 = vld [vmem:[#allocation2 + $0x24] ss:$8 sps:$4 sm:$0xff]   ;;  %v1287_v19 = vld [vmem:[#allocation2 + $0x20] ss:$8 sps:$4 sm:$0xff]  }
  0x2a   :  { %461 = vmatpush1.bf16.msra.mxu1 %v1281_v15  ;;  %v1288_v20 = vld [vmem:[#allocation2 + $0x34] ss:$8 sps:$4 sm:$0xff]   ;;  %v1290_v21 = vld [vmem:[#allocation2 + $0x30] ss:$8 sps:$4 sm:$0xff]   ;;  %v1291_v22 = vld [vmem:[#allocation2 + $0x44] ss:$8 sps:$4 sm:$0xff]  }
  0x2b   :  { %462 = vmatprep.subr.bf16.mxu1 %v1282_v16  ;;  %v1293_v23 = vld [vmem:[#allocation2 + $0x40] ss:$8 sps:$4 sm:$0xff]   ;;  %v1294_v24 = vld [vmem:[#allocation2 + $0x54] ss:$8 sps:$4 sm:$0xff]   ;;  %v1296_v25 = vld [vmem:[#allocation2 + $0x50] ss:$8 sps:$4 sm:$0xff]  }
  0x2c   :  { %113 = vmatpush1.bf16.msra.mxu0 %v1275_v10  ;;  %v1297_v26 = vld [vmem:[#allocation2 + $0x64] ss:$8 sps:$4 sm:$0xff]   ;;  %v1299_v27 = vld [vmem:[#allocation2 + $0x60] ss:$8 sps:$4 sm:$0xff]   ;;  %v1300_v28 = vld [vmem:[#allocation2 + $0x74] ss:$8 sps:$4 sm:$0xff]  }
  0x2d   :  { %114 = vmatprep.subr.bf16.mxu0 %v1276_v12  ;;  %v1302_v29 = vld [vmem:[#allocation2 + $0x70] ss:$8 sps:$4 sm:$0xff]   ;;  %v1303_v30 = vld [vmem:[#allocation2 + $0x84] ss:$8 sps:$4 sm:$0xff]   ;;  %v1305_v31 = vld [vmem:[#allocation2 + $0x80] ss:$8 sps:$4 sm:$0xff]   ;;  %v152_v12 = vlaneseq }
  0x2e   :  { %463 = vmatpush1.bf16.msra.mxu1 %v1284_v17  ;;  %v1306_v32 = vld [vmem:[#allocation2 + $0x94] ss:$8 sps:$4 sm:$0xff]   ;;  %v1308_v33 = vld [vmem:[#allocation2 + $0x90] ss:$8 sps:$4 sm:$0xff]   ;;  %v1309_v34 = vld [vmem:[#allocation2 + $0xa4] ss:$8 sps:$4 sm:$0xff]  }
  0x2f   :  { %464 = vmatprep.subr.bf16.mxu1 %v1285_v18  ;;  %v1311_v35 = vld [vmem:[#allocation2 + $0xa0] ss:$8 sps:$4 sm:$0xff]   ;;  %v1312_v36 = vld [vmem:[#allocation2 + $0xb4] ss:$8 sps:$4 sm:$0xff]   ;;  %v1314_v37 = vld [vmem:[#allocation2 + $0xb0] ss:$8 sps:$4 sm:$0xff]  }
  0x30   :  { %115 = vmatpush1.bf16.msra.mxu0 %v1278_v13  ;;  %v1315_v38 = vld [vmem:[#allocation2 + $0xc4] ss:$8 sps:$4 sm:$0xff]   ;;  %v1317_v39 = vld [vmem:[#allocation2 + $0xc0] ss:$8 sps:$4 sm:$0xff]   ;;  %v1318_v40 = vld [vmem:[#allocation2 + $0xd4] ss:$8 sps:$4 sm:$0xff]  }
  0x31   :  { %v1320_v41 = vld [vmem:[#allocation2 + $0xd0] ss:$8 sps:$4 sm:$0xff]   ;;  %v1321_v42 = vld [vmem:[#allocation2 + $0xe4] ss:$8 sps:$4 sm:$0xff]   ;;  %v1323_v43 = vld [vmem:[#allocation2 + $0xe0] ss:$8 sps:$4 sm:$0xff]  }
  0x32   :  { %465 = vmatpush1.bf16.msra.mxu1 %v1287_v19  ;;  %v1324_v50 = vld [vmem:[#allocation2 + $0xf4] ss:$8 sps:$4 sm:$0xff]   ;;  %v1326_v51 = vld [vmem:[#allocation2 + $0xf0] ss:$8 sps:$4 sm:$0xff]   ;;  %v1329_v52 = vld [vmem:[#allocation2 + $0x104] ss:$8 sps:$4 sm:$0xff]  }
  0x33   :  { %466 = vmatprep.subr.bf16.mxu1 %v1288_v20  ;;  %v1327_v58 = vld [vmem:[#allocation2 + $0x100] ss:$8 sps:$4 sm:$0xff]   ;;  %v1332_v61 = vld [vmem:[#allocation2 + $0x114] ss:$8 sps:$4 sm:$0xff]   ;;  %v1330_v62 = vld [vmem:[#allocation2 + $0x110] ss:$8 sps:$4 sm:$0xff]  }
  0x34   :  { %v1335_v63 = vld [vmem:[#allocation2 + $0x124] ss:$8 sps:$4 sm:$0xff]   ;;  %v1338_v1 = vld [vmem:[#allocation2 + $0x134] ss:$8 sps:$4 sm:$0xff]   ;;  %v1345_v8 = vld [vmem:[#allocation2 + $0x160] ss:$8 sps:$4 sm:$0xff]  }
  0x35   :  { %v1347_v7 = vld [vmem:[#allocation2 + $0x164] ss:$8 sps:$4 sm:$0xff]   ;;  %v1350_v9 = vld [vmem:[#allocation2 + $0x174] ss:$8 sps:$4 sm:$0xff]   ;;  %v1348_v10 = vld [vmem:[#allocation2 + $0x170] ss:$8 sps:$4 sm:$0xff]  }
  0x36   :  { %467 = vmatpush1.bf16.msra.mxu1 %v1290_v21  ;;  %v1581_v13 = vshrl.u32 %v152_v12, 7  ;;  %v208_v15 = vld [vmem:[%s1691_s6] ss:$8 sm:$0x3]  ;;  %vm1005_vm2 = vcmask 261120   ;;  %vm1485_vm3 = vmmov 0  }
  0x37   :  { %468 = vmatprep.subr.bf16.mxu1 %v1291_v22  ;;  %vm1108_vm4 = vcmask 7168  }
  0x38   :  { %v212_v14 = vsub.s32 0, %v1581_v13  ;;  %v216_v16 = vsub.s32 1, %v1581_v13  ;;  %v1401_v13 = vld [vmem:[%s1689_s4 + $0x48] sm:$0xff]  }
  0x3a   :  { %469 = vmatpush1.bf16.msra.mxu1 %v1293_v23  ;;  %v213_v17 = vrot.slane %v208_v15, %v212_v14  ;;  %v217_v18 = vrot.slane %v208_v15, %v216_v16 }
  0x3b   :  { %470 = vmatprep.subr.bf16.mxu1 %v1294_v24 }
  0x3e   :  { %471 = vmatpush1.bf16.msra.mxu1 %v1296_v25 }
  0x3f   :  { %472 = vmatprep.subr.bf16.mxu1 %v1297_v26  ;;  %v1351_v26 = vld [vmem:[#allocation4] ss:$8 sps:$4 sm:$0xff]  }
  0x42   :  { %473 = vmatpush1.bf16.msra.mxu1 %v1299_v27  ;;  %v1353_v27 = vld [vmem:[#allocation4 + $0x4] ss:$8 sps:$4 sm:$0xff]  }
  0x43   :  { %474 = vmatprep.subr.bf16.mxu1 %v1300_v28  ;;  %v1356_v28 = vld [vmem:[#allocation4 + $0x14] ss:$8 sps:$4 sm:$0xff]   ;;  %771 = vmatprep.subr.bf16.mxu0 %v1353_v27 }
  0x46   :  { %475 = vmatpush1.bf16.msra.mxu1 %v1302_v29  ;;  %v1354_v29 = vld [vmem:[#allocation4 + $0x10] ss:$8 sps:$4 sm:$0xff]  }
  0x47   :  { %476 = vmatprep.subr.bf16.mxu1 %v1303_v30  ;;  %v1359_v30 = vld [vmem:[#allocation4 + $0x24] ss:$8 sps:$4 sm:$0xff]  }
  0x4a   :  { %477 = vmatpush1.bf16.msra.mxu1 %v1305_v31  ;;  %v1357_v31 = vld [vmem:[#allocation4 + $0x20] ss:$8 sps:$4 sm:$0xff]  }
  0x4b   :  { %478 = vmatprep.subr.bf16.mxu1 %v1306_v32  ;;  %v1362_v32 = vld [vmem:[#allocation4 + $0x34] ss:$8 sps:$4 sm:$0xff]  }
  0x4e   :  { %479 = vmatpush1.bf16.msra.mxu1 %v1308_v33  ;;  %v1360_v33 = vld [vmem:[#allocation4 + $0x30] ss:$8 sps:$4 sm:$0xff]  }
  0x4f   :  { %480 = vmatprep.subr.bf16.mxu1 %v1309_v34  ;;  %v1365_v34 = vld [vmem:[#allocation4 + $0x44] ss:$8 sps:$4 sm:$0xff]  }
  0x52   :  { %481 = vmatpush1.bf16.msra.mxu1 %v1311_v35  ;;  %v1363_v35 = vld [vmem:[#allocation4 + $0x40] ss:$8 sps:$4 sm:$0xff]  }
  0x53   :  { %482 = vmatprep.subr.bf16.mxu1 %v1312_v36  ;;  %v1368_v36 = vld [vmem:[#allocation4 + $0x54] ss:$8 sps:$4 sm:$0xff]  }
  0x56   :  { %483 = vmatpush1.bf16.msra.mxu1 %v1314_v37  ;;  %v1366_v37 = vld [vmem:[#allocation4 + $0x50] ss:$8 sps:$4 sm:$0xff]  }
  0x57   :  { %484 = vmatprep.subr.bf16.mxu1 %v1315_v38  ;;  %v1371_v38 = vld [vmem:[#allocation4 + $0x64] ss:$8 sps:$4 sm:$0xff]  }
  0x5a   :  { %485 = vmatpush1.bf16.msra.mxu1 %v1317_v39  ;;  %v1369_v39 = vld [vmem:[#allocation4 + $0x60] ss:$8 sps:$4 sm:$0xff]  }
  0x5b   :  { %486 = vmatprep.subr.bf16.mxu1 %v1318_v40  ;;  %v1374_v40 = vld [vmem:[#allocation4 + $0x74] ss:$8 sps:$4 sm:$0xff]  }
  0x5e   :  { %487 = vmatpush1.bf16.msra.mxu1 %v1320_v41  ;;  %v1372_v41 = vld [vmem:[#allocation4 + $0x70] ss:$8 sps:$4 sm:$0xff]  }
  0x5f   :  { %488 = vmatprep.subr.bf16.mxu1 %v1321_v42  ;;  %v1377_v42 = vld [vmem:[#allocation4 + $0x84] ss:$8 sps:$4 sm:$0xff]  }
  0x62   :  { %489 = vmatpush1.bf16.msra.mxu1 %v1323_v43  ;;  %v1375_v43 = vld [vmem:[#allocation4 + $0x80] ss:$8 sps:$4 sm:$0xff]  }
  0x63   :  { %490 = vmatprep.subr.bf16.mxu1 %v1324_v50 }
  0x66   :  { %491 = vmatpush1.bf16.msra.mxu1 %v1326_v51 }
  0x67   :  { %501 = vmatprep.subr.bf16.mxu1 %v1329_v52 }
  0xb4   :  { %v59_v2 = vpop.xlane.xlu0 %58 }
  0xb5   :  { %v60_v3 = vmul.f32 0.020833334, %v59_v2  ;;  %v1336_v2 = vld [vmem:[#allocation2 + $0x130] ss:$8 sps:$4 sm:$0xff]  }
  0xb7   :  { %v1554_v4 = vsub.f32 %v55_v0, %v60_v3  ;;  %v1333_v0 = vld [vmem:[#allocation2 + $0x120] ss:$8 sps:$4 sm:$0xff]   ;;  %v1341_v3 = vld [vmem:[#allocation2 + $0x144] ss:$8 sps:$4 sm:$0xff]  }
  0xb9   :  { %v62_v5 = vmul.f32 %v1554_v4, %v1554_v4 }
  0xbb   :  { %v63_v6 = vsel %vm56_vm0, %v62_v5, 0.0  ;;  %v1344_v5 = vld [vmem:[#allocation2 + $0x154] ss:$8 sps:$4 sm:$0xff]  }
  0xbc   :  { %64 = vadd.xlane.f32.xlu0 %v63_v6  ;;  %v1342_v6 = vld [vmem:[#allocation2 + $0x150] ss:$8 sps:$4 sm:$0xff]  }
 0x149   :  { %v65_v44 = vpop.xlane.xlu0 %64 }
 0x14a   :  { %v66_v45 = vmul.f32 0.020833334, %v65_v44  ;;  %v1380_v44 = vld [vmem:[#allocation4 + $0x94] ss:$8 sps:$4 sm:$0xff]  }
 0x14c   :  { %v67_v46 = vadd.f32 1e-05, %v66_v45  ;;  %v1378_v45 = vld [vmem:[#allocation4 + $0x90] ss:$8 sps:$4 sm:$0xff]  }
 0x14e   :  { %1417 = vrsqrt.f32 %v67_v46  ;;  %v1383_v46 = vld [vmem:[#allocation4 + $0xa4] ss:$8 sps:$4 sm:$0xff]  }
 0x158   :  { %v1418_v47 = vpop.eup %1417 }
 0x159   :  { %v69_v48 = vmul.f32 %v1418_v47, %v1554_v4  ;;  %v1339_v4 = vld [vmem:[#allocation2 + $0x140] ss:$8 sps:$4 sm:$0xff]  }
 0x15a   :  { %v1381_v47 = vld [vmem:[#allocation4 + $0xa0] ss:$8 sps:$4 sm:$0xff]  }
 0x15b   :  { %v70_v49 = vpack.c.bf16 %v69_v48, %v69_v48  ;;  %v153_v48 = vand.u32 127, %v152_v12 }
 0x15d   :  { %1122 = vmatmul.mubr.msk.bf16.vlgmr.msra.gmra.mrb[0].mxu0 %vm56_vm0, %v70_v49  ;;  %v1592_v49 = vadd.s32 128, %v153_v48  ;;  %v1414_v48 = vld [vmem:[%s1689_s4 + $0x38] sm:$0xff]  }
 0x15e   :  { %772 = vmatpush1.bf16.msra.mxu0 %v1351_v26 }
 0x15f   :  { %773 = vmatprep.subr.bf16.mxu0 %v1356_v28  ;;  %vm156_vm1 = vcmp.lt.s32.totalorder %v1592_v49, 240  ;;  %v1399_v28 = vld [vmem:[%s1689_s4 + $0x40] sm:$0xff]  }
 0x162   :  { %774 = vmatpush1.bf16.msra.mxu0 %v1354_v29  ;;  %v1400_v29 = vld [vmem:[%s1689_s4] sm:$0xff]  }
 0x163   :  { %775 = vmatprep.subr.bf16.mxu0 %v1359_v30 }
 0x166   :  { %776 = vmatpush1.bf16.msra.mxu0 %v1357_v31 }
 0x167   :  { %777 = vmatprep.subr.bf16.mxu0 %v1362_v32 }
 0x16a   :  { %778 = vmatpush1.bf16.msra.mxu0 %v1360_v33 }
 0x16b   :  { %779 = vmatprep.subr.bf16.mxu0 %v1365_v34 }
 0x16e   :  { %780 = vmatpush1.bf16.msra.mxu0 %v1363_v35 }
 0x16f   :  { %781 = vmatprep.subr.bf16.mxu0 %v1368_v36 }
 0x172   :  { %782 = vmatpush1.bf16.msra.mxu0 %v1366_v37 }
 0x173   :  { %783 = vmatprep.subr.bf16.mxu0 %v1371_v38  ;;  %v1404_v38 = vld [vmem:[%s1689_s4 + $0x10] sm:$0xff]  }
 0x176   :  { %784 = vmatpush1.bf16.msra.mxu0 %v1369_v39  ;;  %v1405_v39 = vld [vmem:[%s1689_s4 + $0x58] sm:$0xff]  }
 0x177   :  { %785 = vmatprep.subr.bf16.mxu0 %v1374_v40  ;;  %v1406_v40 = vld [vmem:[%s1689_s4 + $0x18] sm:$0xff]  }
 0x17a   :  { %786 = vmatpush1.bf16.msra.mxu0 %v1372_v41  ;;  %v1407_v41 = vld [vmem:[%s1689_s4 + $0x60] sm:$0xff]  }
 0x17b   :  { %787 = vmatprep.subr.bf16.mxu0 %v1377_v42  ;;  %v1408_v42 = vld [vmem:[%s1689_s4 + $0x20] sm:$0xff]  }
 0x17e   :  { %788 = vmatpush1.bf16.msra.mxu0 %v1375_v43  ;;  %v1409_v43 = vld [vmem:[%s1689_s4 + $0x68] sm:$0xff]  }
 0x17f   :  { %789 = vmatprep.subr.bf16.mxu0 %v1380_v44  ;;  %v1410_v44 = vld [vmem:[%s1689_s4 + $0x28] sm:$0xff]  }
 0x182   :  { %790 = vmatpush1.bf16.msra.mxu0 %v1378_v45  ;;  %v1411_v45 = vld [vmem:[%s1689_s4 + $0x70] sm:$0xff]  }
 0x183   :  { %791 = vmatprep.subr.bf16.mxu0 %v1383_v46  ;;  %v1412_v46 = vld [vmem:[%s1689_s4 + $0x30] sm:$0xff]  }
 0x186   :  { %792 = vmatpush1.bf16.msra.mxu0 %v1381_v47  ;;  %v1413_v47 = vld [vmem:[%s1689_s4 + $0x78] sm:$0xff]  }
 0x230   :  { %v144_v53 = vpop.f32.mrb[0].mxu0 }
 0x231   :  { %v146_v54 = vpop.f32.mrb[1].mxu0  ;;  %v157_v59 = vpack.c.bf16 %v144_v53, %v144_v53 }
 0x232   :  { %v151_v55 = vmul.f32 %v146_v54, %v144_v53  ;;  %v148_v56 = vpop.f32.mrb[2].mxu0  ;;  %v158_v57 = vpack.c.bf16 %v146_v54, %v146_v54 }
 0x233   :  { %v149_v60 = vpop.f32.mrb[3].mxu0 }
 0x234   :  { %492 = vmatprep.mubr.bf16.mxu1 %v158_v57  ;;  %v1387_v60 = vld [vmem:[#allocation4 + $0xc0] ss:$8 sps:$4 sm:$0xff]  }
 0x235   :  { %493 = vmatmul.mubr.bf16.vlgmr.msra.gmra.mrb[0].mxu1 %v157_v59  ;;  %v1384_v59 = vld [vmem:[#allocation4 + $0xb0] ss:$8 sps:$4 sm:$0xff]  }
 0x236   :  { %502 = vmatpush1.bf16.msra.mxu1 %v1327_v58  ;;  %533 = vmatprep.mubr.bf16.mxu1 %v1483_v11  ;;  %v159_v11 = vpack.c.bf16 %v151_v55, %v151_v55  ;;  %v1386_v58 = vld [vmem:[#allocation4 + $0xb4] ss:$8 sps:$4 sm:$0xff]  }
 0x237   :  { %503 = vmatprep.subr.bf16.mxu1 %v1332_v61  ;;  %793 = vmatprep.subr.bf16.mxu0 %v1386_v58  ;;  %v1389_v61 = vld [vmem:[#allocation4 + $0xc4] ss:$8 sps:$4 sm:$0xff]  }
 0x238   :  { %794 = vmatpush1.bf16.msra.mxu0 %v1384_v59 }
 0x239   :  { %795 = vmatprep.subr.bf16.mxu0 %v1389_v61 }
 0x23a   :  { %504 = vmatpush1.bf16.msra.mxu1 %v1330_v62  ;;  %v1392_v62 = vld [vmem:[#allocation4 + $0xd4] ss:$8 sps:$4 sm:$0xff]  }
 0x23b   :  { %505 = vmatprep.subr.bf16.mxu1 %v1335_v63  ;;  %v1390_v63 = vld [vmem:[#allocation4 + $0xd0] ss:$8 sps:$4 sm:$0xff]  }
 0x23c   :  { %796 = vmatpush1.bf16.msra.mxu0 %v1387_v60 }
 0x23d   :  { %797 = vmatprep.subr.bf16.mxu0 %v1392_v62 }
 0x23e   :  { %506 = vmatpush1.bf16.msra.mxu1 %v1333_v0  ;;  %v1395_v0 = vld [vmem:[#allocation4 + $0xe4] ss:$8 sps:$4 sm:$0xff]  }
 0x23f   :  { %507 = vmatprep.subr.bf16.mxu1 %v1338_v1  ;;  %v1393_v1 = vld [vmem:[#allocation4 + $0xe0] ss:$8 sps:$4 sm:$0xff]  }
 0x240   :  { %798 = vmatpush1.bf16.msra.mxu0 %v1390_v63  ;;  %v868_v63 = vld [vmem:[%s1691_s6 + $0x2] ss:$0 sm:$0xff] }
 0x241   :  { %799 = vmatprep.subr.bf16.mxu0 %v1395_v0 }
 0x242   :  { %508 = vmatpush1.bf16.msra.mxu1 %v1336_v2  ;;  %v1398_v2 = vld [vmem:[#allocation4 + $0xf4] ss:$8 sps:$4 sm:$0xff]  }
 0x243   :  { %509 = vmatprep.subr.bf16.mxu1 %v1341_v3  ;;  %v1396_v3 = vld [vmem:[#allocation4 + $0xf0] ss:$8 sps:$4 sm:$0xff]  }
 0x244   :  { %800 = vmatpush1.bf16.msra.mxu0 %v1393_v1 }
 0x245   :  { %801 = vmatprep.subr.bf16.mxu0 %v1398_v2 }
 0x246   :  { %510 = vmatpush1.bf16.msra.mxu1 %v1339_v4 }
 0x247   :  { %511 = vmatprep.subr.bf16.mxu1 %v1344_v5 }
 0x248   :  { %802 = vmatpush1.bf16.msra.mxu0 %v1396_v3 }
 0x249   :  { %1224 = vmatprep.subr.bf16.mxu0 %v1399_v28 }
 0x24a   :  { %512 = vmatpush1.bf16.msra.mxu1 %v1342_v6 }
 0x24b   :  { %513 = vmatprep.subr.bf16.mxu1 %v1347_v7 }
 0x24e   :  { %514 = vmatpush1.bf16.msra.mxu1 %v1345_v8 }
 0x24f   :  { %515 = vmatprep.subr.bf16.mxu1 %v1350_v9 }
 0x252   :  { %516 = vmatpush1.bf16.msra.mxu1 %v1348_v10 }
 0x255   :  { %534 = vmatmul.mubr.bf16.vlgmr.msra.gmra.mrb[0].mxu1 %v159_v11 }
 0x328   :  { %v535_v19 = vpop.f32.mrb[0].mxu1 }
 0x329   :  { %v1257_v20 = vadd.f32 %v535_v19, %v213_v17  ;;  %v537_v21 = vpop.f32.mrb[1].mxu1 }
 0x32a   :  { %v1258_v22 = vadd.f32 %v537_v21, %v217_v18  ;;  %v539_v23 = vpop.f32.mrb[2].mxu1  ;;  %v1171_v18 = vld [vmem:[%s1691_s6 + $0x1] ss:$8 sm:$0x3] }
 0x32b   :  { %v540_v24 = vpop.f32.mrb[3].mxu1  ;;  %v604_v19 = vrot.slane %v1171_v18, %v212_v14  ;;  %v1402_v14 = vld [vmem:[%s1689_s4 + $0x8] sm:$0xff]  }
 0x32c   :  { %v542_v25 = vadd.f32 %v1258_v22, %v1257_v20 }
 0x32e   :  { %543 = vadd.xlane.f32.xlu1 %v542_v25 }
 0x3bb   :  { %v544_v50 = vpop.xlane.xlu1 %543 }
 0x3bc   :  { %v545_v51 = vmul.f32 0.004166667, %v544_v50 }
 0x3be   :  { %v546_v52 = vsub.f32 %v1257_v20, %v545_v51  ;;  %v547_v53 = vsub.f32 %v1258_v22, %v545_v51  ;;  %v608_v20 = vrot.slane %v1171_v18, %v216_v16  ;;  %v1403_v16 = vld [vmem:[%s1689_s4 + $0x50] sm:$0xff]  }
 0x3c0   :  { %v549_v54 = vsel %vm156_vm1, %v547_v53, 0.0  ;;  %v550_v55 = vmul.f32 %v546_v52, %v546_v52 }
 0x3c1   :  { %v551_v56 = vmul.f32 %v549_v54, %v549_v54 }
 0x3c3   :  { %v552_v57 = vadd.f32 %v551_v56, %v550_v55 }
 0x3c5   :  { %553 = vadd.xlane.f32.xlu1 %v552_v57 }
 0x452   :  { %v554_v4 = vpop.xlane.xlu1 %553 }
 0x453   :  { %v555_v5 = vmul.f32 0.004166667, %v554_v4 }
 0x455   :  { %v556_v6 = vadd.f32 1e-08, %v555_v5 }
 0x457   :  { %1419 = vrsqrt.f32 %v556_v6 }
 0x461   :  { %v1420_v7 = vpop.eup %1419 }
 0x462   :  { %v559_v8 = vmul.f32 %v1420_v7, %v547_v53  ;;  %v558_v9 = vmul.f32 %v1420_v7, %v546_v52 }
 0x464   :  { %v561_v10 = vsel %vm156_vm1, %v559_v8, 0.0  ;;  %v562_v11 = vmax.f32 %v558_v9, 0.0  ;;  %v1415_v9 = vld [vmem:[%s1690_s5] sm:$0xff]  }
 0x465   :  { %v563_v12 = vmax.f32 %v561_v10, 0.0  ;;  %v1484_v10 = vmov 0.0  }
 0x466   :  { %v564_v17 = vpack.c.bf16 %v562_v11, %v562_v11  ;;  %1249 = vmatprep.subr.bf16.mxu1 %v1484_v10  ;;  %v1416_v11 = vld [vmem:[%s1690_s5 + $0x8] sm:$0xff]   ;;  %1253 = vmatprep.mubr.msk.bf16.mxu1 %vm1485_vm3, %v1484_v10 }
 0x467   :  { %v565_v15 = vpack.c.bf16 %v563_v12, %v563_v12  ;;  %1250 = vmatpush3.bf16.msra.mxu1 %v1415_v9 }
 0x468   :  { %1251 = vmatprep.subr.bf16.mxu1 %v1484_v10 }
 0x469   :  { %803 = vmatprep.mubr.bf16.mxu0 %v565_v15 }
 0x46a   :  { %804 = vmatmul.mubr.bf16.vlgmr.msra.gmra.mrb[4].mxu0 %v564_v17 }
 0x46b   :  { %1225 = vmatpush3.bf16.msra.mxu0 %v1400_v29  ;;  %1252 = vmatpush3.bf16.msra.mxu1 %v1416_v11 }
 0x46c   :  { %1226 = vmatprep.subr.bf16.mxu0 %v1401_v13 }
 0x46f   :  { %1227 = vmatpush3.bf16.msra.mxu0 %v1402_v14 }
 0x470   :  { %1228 = vmatprep.subr.bf16.mxu0 %v1403_v16 }
 0x473   :  { %1229 = vmatpush3.bf16.msra.mxu0 %v1404_v38 }
 0x474   :  { %1230 = vmatprep.subr.bf16.mxu0 %v1405_v39 }
 0x477   :  { %1231 = vmatpush3.bf16.msra.mxu0 %v1406_v40  ;;  %v1100_v40 = vld [vmem:[%s1691_s6 + $0x4] ss:$0 sm:$0xff] }
 0x478   :  { %1232 = vmatprep.subr.bf16.mxu0 %v1407_v41 }
 0x47b   :  { %1233 = vmatpush3.bf16.msra.mxu0 %v1408_v42 }
 0x47c   :  { %1234 = vmatprep.subr.bf16.mxu0 %v1409_v43 }
 0x47f   :  { %1235 = vmatpush3.bf16.msra.mxu0 %v1410_v44 }
 0x480   :  { %1236 = vmatprep.subr.bf16.mxu0 %v1411_v45 }
 0x483   :  { %1237 = vmatpush3.bf16.msra.mxu0 %v1412_v46 }
 0x484   :  { %1238 = vmatprep.subr.bf16.mxu0 %v1413_v47 }
 0x487   :  { %1239 = vmatpush3.bf16.msra.mxu0 %v1414_v48 }
 0x53d   :  { %v805_v21 = vpop.f32.mrb[4].mxu0 }
 0x53e   :  { %v806_v22 = vadd.f32 %v805_v21, %v604_v19  ;;  %v807_v23 = vpop.f32.mrb[5].mxu0 }
 0x53f   :  { %v808_v24 = vadd.f32 %v807_v23, %v608_v20  ;;  %v809_v25 = vpop.f32.mrb[6].mxu0 }
 0x540   :  { %v810_v26 = vpop.f32.mrb[7].mxu0 }
 0x541   :  { %v812_v27 = vadd.f32 %v808_v24, %v806_v22 }
 0x543   :  { %813 = vadd.xlane.f32.xlu0 %v812_v27 }
 0x5d0   :  { %v814_v30 = vpop.xlane.xlu0 %813 }
 0x5d1   :  { %v815_v31 = vmul.f32 0.004166667, %v814_v30 }
 0x5d3   :  { %v816_v32 = vsub.f32 %v806_v22, %v815_v31  ;;  %v817_v33 = vsub.f32 %v808_v24, %v815_v31  ;;  %v1025_v22 = vld [vmem:[%s1691_s6 + $0x3] ss:$0 sm:$0xff] }
 0x5d5   :  { %v819_v34 = vsel %vm156_vm1, %v817_v33, 0.0  ;;  %v820_v35 = vmul.f32 %v816_v32, %v816_v32 }
 0x5d6   :  { %v821_v36 = vmul.f32 %v819_v34, %v819_v34 }
 0x5d8   :  { %v822_v37 = vadd.f32 %v821_v36, %v820_v35  ;;  %v1095_v36 = vld [vmem:[%s1691_s6 + $0x5] ss:$0 sm:$0xff] }
 0x5da   :  { %823 = vadd.xlane.f32.xlu1 %v822_v37 }
 0x667   :  { %v824_v50 = vpop.xlane.xlu1 %823 }
 0x668   :  { %v825_v51 = vmul.f32 0.004166667, %v824_v50 }
 0x66a   :  { %v826_v52 = vadd.f32 1e-08, %v825_v51 }
 0x66c   :  { %1421 = vrsqrt.f32 %v826_v52 }
 0x676   :  { %v1422_v53 = vpop.eup %1421 }
 0x677   :  { %v829_v54 = vmul.f32 %v1422_v53, %v817_v33  ;;  %v828_v55 = vmul.f32 %v1422_v53, %v816_v32 }
 0x679   :  { %v831_v56 = vsel %vm156_vm1, %v829_v54, 0.0  ;;  %v832_v57 = vmax.f32 %v828_v55, 0.0 }
 0x67a   :  { %v833_v58 = vmax.f32 %v831_v56, 0.0 }
 0x67b   :  { %v834_v60 = vpack.c.bf16 %v832_v57, %v832_v57 }
 0x67c   :  { %v835_v59 = vpack.c.bf16 %v833_v58, %v833_v58 }
 0x67e   :  { %997 = vmatprep.mubr.bf16.mxu0 %v835_v59 }
 0x67f   :  { %998 = vmatmul.mubr.bf16.vlgmr.msra.gmra.mrb[8].mxu0 %v834_v60 }
 0x752   :  { %v1240_v61 = vpop.f32.mrb[8].mxu0 }
 0x753   :  { %v1241_v62 = vpop.f32.mrb[9].mxu0 }
 0x754   :  { %v1242_v0 = vadd.f32 %v1241_v62, %v1240_v61  ;;  %v1243_v1 = vpop.f32.mrb[10].mxu0 }
 0x755   :  { %v1244_v2 = vpop.f32.mrb[11].mxu0 }
 0x756   :  { %v1000_v3 = vadd.f32 %v1242_v0, %v868_v63 }
 0x758   :  { %v1006_v49 = vsel %vm1005_vm2, %v1000_v3, 0.0 }
 0x759   :  { %1007 = vadd.xlane.f32.xlu0 %v1006_v49 }
 0x7e6   :  { %v1008_v4 = vpop.xlane.xlu0 %1007 }
 0x7e7   :  { %v1009_v5 = vmul.f32 0.03125, %v1008_v4 }
 0x7e9   :  { %v1010_v6 = vsub.f32 %v1000_v3, %v1009_v5 }
 0x7eb   :  { %v1011_v7 = vmul.f32 %v1010_v6, %v1010_v6 }
 0x7ed   :  { %v1012_v8 = vsel %vm1005_vm2, %v1011_v7, 0.0 }
 0x7ee   :  { %1013 = vadd.xlane.f32.xlu1 %v1012_v8 }
 0x87b   :  { %v1014_v12 = vpop.xlane.xlu1 %1013 }
 0x87c   :  { %v1015_v15 = vmul.f32 0.03125, %v1014_v12 }
 0x87e   :  { %v1016_v17 = vadd.f32 1e-08, %v1015_v15 }
 0x880   :  { %1423 = vrsqrt.f32 %v1016_v17 }
 0x88a   :  { %v1424_v18 = vpop.eup %1423 }
 0x88b   :  { %v1018_v19 = vmul.f32 %v1424_v18, %v1010_v6 }
 0x88d   :  { %v1019_v20 = vmax.f32 %v1018_v19, 0.0 }
 0x88f   :  { %v1020_v21 = vpack.c.bf16 %v1019_v20, %v1019_v20 }
 0x891   :  { %1254 = vmatmul.mubr.msk.bf16.vlgmr.msra.gmra.mrb[4].mxu1 %vm1005_vm2, %v1020_v21 }
 0x964   :  { %v1075_v23 = vpop.f32.mrb[4].mxu1 }
 0x965   :  { %v1076_v24 = vadd.f32 %v1075_v23, %v1025_v22  ;;  %v1255_v25 = vpop.f32.mrb[5].mxu1 }
 0x966   :  { %v1078_v26 = vpop.f32.mrb[6].mxu1 }
 0x967   :  { %v1256_v27 = vpop.f32.mrb[7].mxu1  ;;  %v1081_v28 = vsel %vm1005_vm2, %v1076_v24, 0.0 }
 0x968   :  { %1082 = vadd.xlane.f32.xlu0 %v1081_v28 }
 0x9f5   :  { %v1083_v29 = vpop.xlane.xlu0 %1082 }
 0x9f6   :  { %v1084_v13 = vmul.f32 0.03125, %v1083_v29 }
 0x9f8   :  { %v1085_v14 = vsub.f32 %v1076_v24, %v1084_v13 }
 0x9fa   :  { %v1086_v16 = vmul.f32 %v1085_v14, %v1085_v14 }
 0x9fc   :  { %v1087_v30 = vsel %vm1005_vm2, %v1086_v16, 0.0 }
 0x9fd   :  { %1088 = vadd.xlane.f32.xlu1 %v1087_v30 }
 0xa8a   :  { %v1089_v31 = vpop.xlane.xlu1 %1088 }
 0xa8b   :  { %v1090_v32 = vmul.f32 0.03125, %v1089_v31 }
 0xa8d   :  { %v1091_v33 = vadd.f32 1e-08, %v1090_v32 }
 0xa8f   :  { %1425 = vrsqrt.f32 %v1091_v33 }
 0xa99   :  { %v1426_v34 = vpop.eup %1425 }
 0xa9a   :  { %v1093_v35 = vmul.f32 %v1426_v34, %v1085_v14 }
 0xa9c   :  { %v1094_v37 = vmax.f32 %v1093_v35, 0.0 }
 0xa9e   :  { %v1096_v38 = vmul.f32 %v1095_v36, %v1094_v37 }
 0xaa0   :  { %v1097_v39 = vsel %vm1005_vm2, %v1096_v38, 0.0 }
 0xaa1   :  { %1098 = vadd.xlane.f32.xlu0 %v1097_v39 }
 0xb2e   :  { %v1099_v41 = vpop.xlane.xlu0 %1098 }
 0xb2f   :  { %v1101_v42 = vadd.f32 %v1100_v40, %v1099_v41 }
 0xb31   :  { %v1223_v43 = vmul.f32 -1.442695, %v1101_v42 }
 0xb33   :  { %1427 = vpow2.f32 %v1223_v43 }
 0xb3d   :  { %v1428_v44 = vpop.eup %1427 }
 0xb3e   :  { %v1105_v45 = vadd.f32 1.0, %v1428_v44 }
 0xb40   :  { %1429 = vrcp.f32 %v1105_v45 }
 0xb4a   :  { %v1430_v46 = vpop.eup %1429 }
 0xb4b   :  { %1109 = vst.msk [vmem:[%s1692_s7] sm:$0xff] %vm1108_vm4, %v1430_v46 }
 0xb4c   :  { %1114 = vsyncpa [#allocation3], 1 }
 0xb4d   :  { %1115 = vsyncpa [#allocation5], 1 }

</bundles_post_ra>
